<compile_context>
chip_gen: v5e
topology: v5e:2x2
jax: 0.10.0
libtpu: 0.0.40
codegen_flags: <defaults>
</compile_context>

<pallas_src>
import jax
import jax.numpy as jnp
from jax.experimental import pallas as pl
from jax.experimental.pallas import tpu as pltpu


def _conv_stats_kernel(x_ref, w_ref, stats_ref):
    """Phase 1: circular Conv1d(k=3, no bias) + per-channel (sum, sumsq) partials.

    x_ref:     [Bb, L, C]  input dtype (cast to bf16 for the MXU)
    w_ref:     [3, C, C]   bf16 taps, w_ref[k][i, o] = conv_weight[o, i, k]
    stats_ref: [2, C]      f32 partials over this block (row 0: sum, row 1: sumsq)
    """
    bb, l, c = x_ref.shape
    w0 = w_ref[0]
    w1 = w_ref[1]
    w2 = w_ref[2]
    s_tot = jnp.zeros((1, c), jnp.float32)
    ss_tot = jnp.zeros((1, c), jnp.float32)
    for b in range(bb):                                   # static unroll, Bb is small
        xb = x_ref[b].astype(jnp.bfloat16)                # [L, C]
        # conv[l] = x[l-1] @ W0 + x[l] @ W1 + x[l+1] @ W2   (circular along L)
        conv = jnp.dot(xb, w1, preferred_element_type=jnp.float32)
        conv = conv + pltpu.roll(
            jnp.dot(xb, w0, preferred_element_type=jnp.float32), shift=1, axis=0)
        conv = conv + pltpu.roll(
            jnp.dot(xb, w2, preferred_element_type=jnp.float32), shift=l - 1, axis=0)
        s_tot = s_tot + jnp.sum(conv, axis=0, keepdims=True)
        ss_tot = ss_tot + jnp.sum(conv * conv, axis=0, keepdims=True)
    stats_ref[...] = jnp.concatenate([s_tot, ss_tot], axis=0)


def _conv_bn_pool_elu_kernel(x_ref, w_ref, scale_ref, shift_ref, o_ref, y_ref):
    """Phase 2: recomputed conv + folded BN affine + MaxPool1d(3,2,1) + ELU (after pool).

    x_ref: [Bb, L, C] ; w_ref: [3, C, C] bf16 ; scale/shift: [1, C] f32
    o_ref: [Bb, L_out, C] (x.dtype) ; y_ref: [L, C] f32 VMEM scratch
    """
    bb, l, c = x_ref.shape
    l_out = o_ref.shape[1]
    n_odd = l // 2
    w0 = w_ref[0]
    w1 = w_ref[1]
    w2 = w_ref[2]
    scale = scale_ref[...]
    shift = shift_ref[...]
    # Pool pad: pooling now happens BEFORE the ELU, so the pad must be ~-inf.
    neg = jnp.full((1, c), jnp.finfo(jnp.float32).min, dtype=jnp.float32)

    for b in range(bb):                                   # static unroll, Bb is small
        xb = x_ref[b].astype(jnp.bfloat16)
        conv = jnp.dot(xb, w1, preferred_element_type=jnp.float32)
        conv = conv + pltpu.roll(
            jnp.dot(xb, w0, preferred_element_type=jnp.float32), shift=1, axis=0)
        conv = conv + pltpu.roll(
            jnp.dot(xb, w2, preferred_element_type=jnp.float32), shift=l - 1, axis=0)

        # Folded BN affine (conv bias is folded into `shift`; it cancels under
        # batch-statistics BN anyway).
        y_ref[...] = conv * scale + shift

        # MaxPool1d(k=3, s=2, pad=1) via strided sublane reads:
        #   center[j] = y[2j], odd[j] = y[2j+1], left tap y[2j-1] = odd shifted down.
        center = y_ref[pl.ds(0, l_out, stride=2), :]
        odd = y_ref[pl.ds(1, n_odd, stride=2), :]
        left = jnp.concatenate([neg, odd[:l_out - 1, :]], axis=0)
        if n_odd == l_out:                                # even L
            right = odd
        else:                                             # odd L: last right tap is pad
            right = jnp.concatenate([odd, neg], axis=0)
        m = jnp.maximum(jnp.maximum(center, left), right)

        # ELU only on the pooled rows (monotone => pool-then-ELU == ELU-then-pool).
        o_ref[b] = jnp.where(m > 0.0, m, jnp.exp(m) - 1.0).astype(o_ref.dtype)


def _pick_block_b(B, L, C, itemsize, bytes_target=2 * 1024 * 1024, max_bb=8):
    """Largest divisor of B (<= max_bb) whose x-block stays under bytes_target."""
    per_batch = L * C * itemsize
    bb = 1
    for cand in range(2, max_bb + 1):
        if B % cand == 0 and cand * per_batch <= bytes_target:
            bb = cand
    return bb


def conv_encoder_layer(x, conv_weight, conv_bias, bn_gamma, bn_beta, eps=1e-5):
    """x: [B, L, C]. conv_weight: [C_out, C_in, 3] (PyTorch layout). Returns [B, L_out, C]."""
    B, L, C = x.shape
    L_out = (L - 1) // 2 + 1
    f32 = jnp.float32

    # Tiny weight transform: [C_out, C_in, 3] -> bf16 taps [3, C_in, C_out] (VMEM-resident).
    w_taps = jnp.transpose(conv_weight.astype(f32), (2, 1, 0)).astype(jnp.bfloat16)

    # Per-generation VMEM budget: ~3/4 of physical VMEM (48 MiB on v7x, 96 MiB v5e/v6e).
    try:
        vmem_cap = pltpu.get_tpu_info().vmem_capacity_bytes
        vmem_limit = min((int(vmem_cap) * 3) // 4, 100 * 1024 * 1024)
    except Exception:
        vmem_limit = 32 * 1024 * 1024
    cparams = pltpu.CompilerParams(
        dimension_semantics=("parallel",),       # batch blocks are independent
        vmem_limit_bytes=vmem_limit,
    )

    block_b = _pick_block_b(B, L, C, jnp.dtype(x.dtype).itemsize)
    nb = B // block_b

    # ---------------- phase 1: conv + per-block BN-stat partials ----------------
    part_stats = pl.pallas_call(
        _conv_stats_kernel,
        grid=(nb,),
        in_specs=[
            pl.BlockSpec((block_b, L, C), lambda i: (i, 0, 0)),   # x block
            pl.BlockSpec((3, C, C), lambda i: (0, 0, 0)),         # taps (resident)
        ],
        out_specs=pl.BlockSpec((None, 2, C), lambda i: (i, 0, 0)),
        out_shape=jax.ShapeDtypeStruct((nb, 2, C), f32),
        compiler_params=cparams,
    )(x, w_taps)

    # ---- global stats combine + fold BN (+ conv bias) into one scale/shift (plain JAX) ----
    n = f32(B * L)
    s = jnp.sum(part_stats[:, 0, :], axis=0)                      # sum of conv (no bias)
    ss = jnp.sum(part_stats[:, 1, :], axis=0)                     # sum of conv^2 (no bias)
    mean_nb = s / n
    var = jnp.maximum(ss / n - mean_nb * mean_nb, 0.0)            # bias-independent
    inv_std = jax.lax.rsqrt(var + eps)
    gamma = bn_gamma.astype(f32)
    beta = bn_beta.astype(f32)
    bias = conv_bias.astype(f32)
    mean_b = mean_nb + bias                                       # batch mean incl. conv bias
    scale = (gamma * inv_std).reshape(1, C)
    shift = (beta + (bias - mean_b) * gamma * inv_std).reshape(1, C)   # bias cancels exactly

    # ---------------- phase 2: conv recompute + BN affine + pool + ELU ----------------
    out = pl.pallas_call(
        _conv_bn_pool_elu_kernel,
        grid=(nb,),
        in_specs=[
            pl.BlockSpec((block_b, L, C), lambda i: (i, 0, 0)),
            pl.BlockSpec((3, C, C), lambda i: (0, 0, 0)),
            pl.BlockSpec((1, C), lambda i: (0, 0)),
            pl.BlockSpec((1, C), lambda i: (0, 0)),
        ],
        out_specs=pl.BlockSpec((block_b, L_out, C), lambda i: (i, 0, 0)),
        out_shape=jax.ShapeDtypeStruct((B, L_out, C), x.dtype),
        scratch_shapes=[pltpu.VMEM((L, C), f32)],
        compiler_params=cparams,
    )(x, w_taps, scale, shift)

    return out


def _reference(x, conv_weight, conv_bias, bn_gamma, bn_beta, eps=1e-5):
    """Pure-JAX PyTorch-semantics reference (NCL layout).

    Conv operands are rounded to bf16 to mirror the kernel's MXU input precision
    (accumulation stays f32), so the comparison isolates structural errors.
    """
    xb = x.astype(jnp.bfloat16).astype(jnp.float32)
    wb = conv_weight.astype(jnp.bfloat16).astype(jnp.float32)
    xc = jnp.transpose(xb, (0, 2, 1))                                   # [B, C, L]
    xpad = jnp.concatenate([xc[:, :, -1:], xc, xc[:, :, :1]], axis=-1)  # circular pad
    conv = jax.lax.conv_general_dilated(
        xpad, wb, window_strides=(1,), padding="VALID",
        dimension_numbers=("NCH", "OIH", "NCH"),
        precision=jax.lax.Precision.HIGHEST)
    conv = conv + conv_bias[None, :, None]
    mean = jnp.mean(conv, axis=(0, 2), keepdims=True)
    var = jnp.mean((conv - mean) ** 2, axis=(0, 2), keepdims=True)
    y = (conv - mean) / jnp.sqrt(var + eps)
    y = y * bn_gamma[None, :, None] + bn_beta[None, :, None]
    y = jnp.where(y > 0, y, jnp.exp(y) - 1.0)                           # ELU
    B, C, L = y.shape
    ypad = jnp.pad(y, ((0, 0), (0, 0), (1, 1)), constant_values=-jnp.inf)
    L_out = (L - 1) // 2 + 1
    cols = [jnp.max(ypad[:, :, 2 * j:2 * j + 3], axis=-1) for j in range(L_out)]
    out = jnp.stack(cols, axis=-1)                                      # [B, C, L_out]
    return jnp.transpose(out, (0, 2, 1))                                # [B, L_out, C]


if __name__ == "__main__":
    B, L, C = 2, 16, 8
    key = jax.random.PRNGKey(0)
    kx, kw, kb, kg, kbeta = jax.random.split(key, 5)

    x = jax.random.normal(kx, (B, L, C), dtype=jnp.float32)
    conv_weight = 0.1 * jax.random.normal(kw, (C, C, 3), dtype=jnp.float32)  # [C_out, C_in, K]
    conv_bias = 0.1 * jax.random.normal(kb, (C,), dtype=jnp.float32)
    bn_gamma = 1.0 + 0.1 * jax.random.normal(kg, (C,), dtype=jnp.float32)
    bn_beta = 0.1 * jax.random.normal(kbeta, (C,), dtype=jnp.float32)

    out = conv_encoder_layer(x, conv_weight, conv_bias, bn_gamma, bn_beta)
    out = jax.block_until_ready(out)

    ref = _reference(x, conv_weight, conv_bias, bn_gamma, bn_beta)
    L_out = (L - 1) // 2 + 1
    assert out.shape == (B, L_out, C), out.shape
    max_err = float(jnp.max(jnp.abs(out - ref)))
    assert jnp.allclose(out, ref, rtol=2e-3, atol=2e-3), max_err
    print("KERNEL_OK")
</pallas_src>

<mosaic_0001>
module attributes {stable_mosaic.version = 11 : i64} {
  func.func @_conv_stats_kernel(%arg0: i32, %arg1: memref<2x16x8xf32, #tpu.memory_space<vmem>>, %arg2: memref<3x8x8xbf16, #tpu.memory_space<vmem>>, %arg3: memref<1x2x8xf32, #tpu.memory_space<vmem>>) attributes {dimension_semantics = [#tpu.dimension_semantics<parallel>], iteration_bounds = array<i64: 1>, scalar_prefetch = 0 : i64, scratch_operands = 0 : i64, tpu.core_type = #tpu.core_type<tc>, window_params = [{transform_indices = @transform_0, window_bounds = array<i64: 2, 16, 8>}, {pipeline_mode = #tpu.pipeline_mode<synchronous>, transform_indices = @transform_1, window_bounds = array<i64: 3, 8, 8>}, {transform_indices = @transform_2, window_bounds = array<i64: 1, 2, 8>}]} {
    %c0 = arith.constant 0 : index
    %c0_0 = arith.constant 0 : index
    %c0_1 = arith.constant 0 : index
    %0 = vector.load %arg2[%c0, %c0_0, %c0_1] : memref<3x8x8xbf16, #tpu.memory_space<vmem>>, vector<1x8x8xbf16>
    %1 = vector.shape_cast %0 : vector<1x8x8xbf16> to vector<8x8xbf16>
    %c1 = arith.constant 1 : index
    %c0_2 = arith.constant 0 : index
    %c0_3 = arith.constant 0 : index
    %2 = vector.load %arg2[%c1, %c0_2, %c0_3] : memref<3x8x8xbf16, #tpu.memory_space<vmem>>, vector<1x8x8xbf16>
    %3 = vector.shape_cast %2 : vector<1x8x8xbf16> to vector<8x8xbf16>
    %c2 = arith.constant 2 : index
    %c0_4 = arith.constant 0 : index
    %c0_5 = arith.constant 0 : index
    %4 = vector.load %arg2[%c2, %c0_4, %c0_5] : memref<3x8x8xbf16, #tpu.memory_space<vmem>>, vector<1x8x8xbf16>
    %5 = vector.shape_cast %4 : vector<1x8x8xbf16> to vector<8x8xbf16>
    %cst = arith.constant 0.000000e+00 : f32
    %6 = vector.broadcast %cst : f32 to vector<1x8xf32>
    %cst_6 = arith.constant 0.000000e+00 : f32
    %7 = vector.broadcast %cst_6 : f32 to vector<1x8xf32>
    %c0_7 = arith.constant 0 : index
    %c0_8 = arith.constant 0 : index
    %c0_9 = arith.constant 0 : index
    %8 = vector.load %arg1[%c0_7, %c0_8, %c0_9] : memref<2x16x8xf32, #tpu.memory_space<vmem>>, vector<1x16x8xf32>
    %9 = vector.shape_cast %8 : vector<1x16x8xf32> to vector<16x8xf32>
    %10 = arith.truncf %9 : vector<16x8xf32> to vector<16x8xbf16>
    %cst_10 = arith.constant dense<0.000000e+00> : vector<16x8xf32>
    %11 = tpu.matmul %10, %3, %cst_10 {dimension_numbers = #tpu.dot_dimension_numbers<[1], [0], [0], [1], [0, 0, 1, 1], [], []>} : vector<16x8xbf16>, vector<8x8xbf16>, vector<16x8xf32> -> vector<16x8xf32>
    %cst_11 = arith.constant dense<0.000000e+00> : vector<16x8xf32>
    %12 = tpu.matmul %10, %1, %cst_11 {dimension_numbers = #tpu.dot_dimension_numbers<[1], [0], [0], [1], [0, 0, 1, 1], [], []>} : vector<16x8xbf16>, vector<8x8xbf16>, vector<16x8xf32> -> vector<16x8xf32>
    %c1_i32 = arith.constant 1 : i32
    %13 = tpu.dynamic_rotate %12 by %c1_i32 dim 0 : vector<16x8xf32>, i32 -> vector<16x8xf32>
    %14 = arith.addf %11, %13 : vector<16x8xf32>
    %cst_12 = arith.constant dense<0.000000e+00> : vector<16x8xf32>
    %15 = tpu.matmul %10, %5, %cst_12 {dimension_numbers = #tpu.dot_dimension_numbers<[1], [0], [0], [1], [0, 0, 1, 1], [], []>} : vector<16x8xbf16>, vector<8x8xbf16>, vector<16x8xf32> -> vector<16x8xf32>
    %c15_i32 = arith.constant 15 : i32
    %16 = tpu.dynamic_rotate %15 by %c15_i32 dim 0 : vector<16x8xf32>, i32 -> vector<16x8xf32>
    %17 = arith.addf %14, %16 : vector<16x8xf32>
    %cst_13 = arith.constant dense<0.000000e+00> : vector<8xf32>
    %18 = vector.multi_reduction <add>, %17, %cst_13 [0] : vector<16x8xf32> to vector<8xf32>
    %19 = vector.shape_cast %18 : vector<8xf32> to vector<1x8xf32>
    %20 = arith.addf %6, %19 : vector<1x8xf32>
    %21 = arith.mulf %17, %17 : vector<16x8xf32>
    %cst_14 = arith.constant dense<0.000000e+00> : vector<8xf32>
    %22 = vector.multi_reduction <add>, %21, %cst_14 [0] : vector<16x8xf32> to vector<8xf32>
    %23 = vector.shape_cast %22 : vector<8xf32> to vector<1x8xf32>
    %24 = arith.addf %7, %23 : vector<1x8xf32>
    %c1_15 = arith.constant 1 : index
    %c0_16 = arith.constant 0 : index
    %c0_17 = arith.constant 0 : index
    %25 = vector.load %arg1[%c1_15, %c0_16, %c0_17] : memref<2x16x8xf32, #tpu.memory_space<vmem>>, vector<1x16x8xf32>
    %26 = vector.shape_cast %25 : vector<1x16x8xf32> to vector<16x8xf32>
    %27 = arith.truncf %26 : vector<16x8xf32> to vector<16x8xbf16>
    %cst_18 = arith.constant dense<0.000000e+00> : vector<16x8xf32>
    %28 = tpu.matmul %27, %3, %cst_18 {dimension_numbers = #tpu.dot_dimension_numbers<[1], [0], [0], [1], [0, 0, 1, 1], [], []>} : vector<16x8xbf16>, vector<8x8xbf16>, vector<16x8xf32> -> vector<16x8xf32>
    %cst_19 = arith.constant dense<0.000000e+00> : vector<16x8xf32>
    %29 = tpu.matmul %27, %1, %cst_19 {dimension_numbers = #tpu.dot_dimension_numbers<[1], [0], [0], [1], [0, 0, 1, 1], [], []>} : vector<16x8xbf16>, vector<8x8xbf16>, vector<16x8xf32> -> vector<16x8xf32>
    %c1_i32_20 = arith.constant 1 : i32
    %30 = tpu.dynamic_rotate %29 by %c1_i32_20 dim 0 : vector<16x8xf32>, i32 -> vector<16x8xf32>
    %31 = arith.addf %28, %30 : vector<16x8xf32>
    %cst_21 = arith.constant dense<0.000000e+00> : vector<16x8xf32>
    %32 = tpu.matmul %27, %5, %cst_21 {dimension_numbers = #tpu.dot_dimension_numbers<[1], [0], [0], [1], [0, 0, 1, 1], [], []>} : vector<16x8xbf16>, vector<8x8xbf16>, vector<16x8xf32> -> vector<16x8xf32>
    %c15_i32_22 = arith.constant 15 : i32
    %33 = tpu.dynamic_rotate %32 by %c15_i32_22 dim 0 : vector<16x8xf32>, i32 -> vector<16x8xf32>
    %34 = arith.addf %31, %33 : vector<16x8xf32>
    %cst_23 = arith.constant dense<0.000000e+00> : vector<8xf32>
    %35 = vector.multi_reduction <add>, %34, %cst_23 [0] : vector<16x8xf32> to vector<8xf32>
    %36 = vector.shape_cast %35 : vector<8xf32> to vector<1x8xf32>
    %37 = arith.addf %20, %36 : vector<1x8xf32>
    %38 = arith.mulf %34, %34 : vector<16x8xf32>
    %cst_24 = arith.constant dense<0.000000e+00> : vector<8xf32>
    %39 = vector.multi_reduction <add>, %38, %cst_24 [0] : vector<16x8xf32> to vector<8xf32>
    %40 = vector.shape_cast %39 : vector<8xf32> to vector<1x8xf32>
    %41 = arith.addf %24, %40 : vector<1x8xf32>
    %42 = tpu.concatenate %37, %41 in 0 : vector<1x8xf32>, vector<1x8xf32> -> vector<2x8xf32>
    %c0_25 = arith.constant 0 : index
    %c0_26 = arith.constant 0 : index
    %c0_27 = arith.constant 0 : index
    %43 = vector.load %arg3[%c0_25, %c0_26, %c0_27] : memref<1x2x8xf32, #tpu.memory_space<vmem>>, vector<1x2x8xf32>
    %44 = vector.shape_cast %43 : vector<1x2x8xf32> to vector<2x8xf32>
    %45 = vector.shape_cast %42 : vector<2x8xf32> to vector<1x2x8xf32>
    tpu.vector_store %arg3[%c0_25, %c0_26, %c0_27], %45 {strides = array<i32>} : memref<1x2x8xf32, #tpu.memory_space<vmem>>, vector<1x2x8xf32>,
    return
  }
  func.func @transform_0(%arg0: i32) -> (i32, i32, i32) {
    %c0_i32 = arith.constant 0 : i32
    %c0_i32_0 = arith.constant 0 : i32
    %c0_i32_1 = arith.constant 0 : i32
    return %arg0, %c0_i32, %c0_i32_0 : i32, i32, i32
  }
  func.func @transform_1(%arg0: i32) -> (i32, i32, i32) {
    %c0_i32 = arith.constant 0 : i32
    %c0_i32_0 = arith.constant 0 : i32
    %c0_i32_1 = arith.constant 0 : i32
    %c0_i32_2 = arith.constant 0 : i32
    return %c0_i32, %c0_i32_0, %c0_i32_1 : i32, i32, i32
  }
  func.func @transform_2(%arg0: i32) -> (i32, i32, i32) {
    %c0_i32 = arith.constant 0 : i32
    %c0_i32_0 = arith.constant 0 : i32
    %c0_i32_1 = arith.constant 0 : i32
    return %arg0, %c0_i32, %c0_i32_0 : i32, i32, i32
  }
}

</mosaic_0001>

<bundles_post_ra>
// kernel: tpu_custom_call.1
= control target key start
LH: loop header
LB: loop body
LE: loop exit
PB: predicated region body
PF: predicated region fallthrough
CT: control target
= control target key end

     0   :  { %vm25_vm0 = vcmask 1043456   ;;  %vm21_vm1 = vcmask 64512   ;;  %s313_s0 = inlined_call_operand.vmem [shape: f32[2,16,8], index: 0, kind: input, shape index: {}]   ;;  %s314_s1 = inlined_call_operand.vmem [shape: bf16[3,8,8], index: 1, kind: input, shape index: {}]   ;;  %s315_s2 = inlined_call_operand.hbm [shape: f32[1,2,8], index: 2, kind: output, shape index: {}]  }
   0x1   :  { %v13_v0 = vld [vmem:[%s314_s1] sm:$0xf]  ;;  %v214_v1 = vld [vmem:[%s314_s1 + $0x4] sm:$0xf]  ;;  %v215_v5 = vld [vmem:[%s314_s1 + $0x8] sm:$0xf] }
   0x2   :  { %v18_v2 = vld [vmem:[%s313_s0] sm:$0xff]  ;;  %v27_v3 = vsel %vm25_vm0, %v13_v0, 0  ;;  %v51_v4 = vsel %vm25_vm0, %v214_v1, 0  ;;  %v19_v6 = vld [vmem:[%s313_s0 + $0x8] sm:$0xff]  ;;  %v68_v7 = vsel %vm25_vm0, %v215_v5, 0  ;;  %v219_v9 = vld [vmem:[%s313_s0 + $0x10] sm:$0xff] }
   0x3   :  { %36 = vmatpush.bf16.msra.mxu0 %v27_v3  ;;  %60 = vmatpush.bf16.msra.mxu1 %v51_v4  ;;  %v20_v8 = vpack.c.bf16 %v19_v6, %v18_v2  ;;  %v220_v10 = vld [vmem:[%s313_s0 + $0x18] sm:$0xff] }
   0x4   :  { %7 = vsyncpa [#allocation3], 0  ;;  %77 = vmatpush.bf16.msra.mxu2 %v68_v7  ;;  %127 = vmatpush.bf16.msra.mxu3 %v27_v3  ;;  %v116_v11 = vpack.c.bf16 %v220_v10, %v219_v9  ;;  %v45_v14 = vlaneseq  ;;  %s251_s0 = smov [#allocation2]   ;;  %s205_s25 = sshll.u32 %s315_s2, 4  ;;  %vm194_vm4 = vcmask 1040384   ;;  %vm196_vm5 = vcmask 58368   ;;  %s206_s25 = int_to_ptr.hbm [resolvable:$true] %s205_s25 }
   0x5   :  { %s203_s1 = sshll.u32 %s251_s0, 4  ;;  %s204_s1 = int_to_ptr.vmem [resolvable:$true] %s203_s1 }
   0x6   :  { %216 = vmatmul.msk.bf16.vlgmr.msra.gmra.mxu0 %vm21_vm1, %v20_v8  ;;  %217 = vmatmul.msk.bf16.vlgmr.msra.gmra.mxu1 %vm21_vm1, %v20_v8  ;;  %v46_v17 = vshrl.u32 %v45_v14, 7 }
   0x7   :  { %159 = vmatpush.bf16.msrb.mxu1 %v68_v7  ;;  %145 = vmatpush.bf16.msrb.mxu0 %v51_v4 }
   0x8   :  { %218 = vmatmul.msk.bf16.vlgmr.msra.gmra.mxu2 %vm21_vm1, %v20_v8  ;;  %221 = vmatmul.msk.bf16.vlgmr.msra.gmra.mxu3 %vm21_vm1, %v116_v11  ;;  %vm47_vm2 = vcmp.lt.s32.totalorder %v46_v17, 1  ;;  %vm86_vm3 = vcmp.lt.s32.totalorder %v46_v17, 7 }
  0x16   :  { %222 = vmatmul.msk.bf16.vlgmr.msrb.gmra.mxu0 %vm21_vm1, %v116_v11  ;;  %223 = vmatmul.msk.bf16.vlgmr.msrb.gmra.mxu1 %vm21_vm1, %v116_v11 }
  0x83   :  { %v38_v12 = vpop.f32.mrf.mxu0  ;;  %v62_v13 = vpop.f32.mrf.mxu1 }
  0x84   :  { %v43_v21 = vrot.slane %v38_v12, 7 }
  0x8b   :  { %v79_v15 = vpop.f32.mrf.mxu2  ;;  %v129_v16 = vpop.f32.mrf.mxu3 }
  0x8c   :  { %v40_v18 = vpop.f32.mrf.mxu0  ;;  %v64_v19 = vpop.f32.mrf.mxu1  ;;  %v84_v22 = vrot.slane %v79_v15, 1  ;;  %v134_v34 = vrot.slane %v129_v16, 7 }
  0x8d   :  { %v44_v20 = vrot.slane %v40_v18, 7 }
  0x8f   :  { %v49_v23 = vsel %vm47_vm2, %v44_v20, %v43_v21  ;;  %v48_v24 = vsel %vm47_vm2, %v43_v21, %v44_v20 }
  0x90   :  { %v63_v30 = vadd.f32 %v62_v13, %v49_v23  ;;  %v65_v31 = vadd.f32 %v64_v19, %v48_v24 }
  0x93   :  { %v81_v25 = vpop.f32.mrf.mxu2  ;;  %v131_v26 = vpop.f32.mrf.mxu3 }
  0x94   :  { %v85_v27 = vrot.slane %v81_v25, 1  ;;  %v147_v28 = vpop.f32.mrf.mxu0  ;;  %v161_v29 = vpop.f32.mrf.mxu1  ;;  %v135_v37 = vrot.slane %v131_v26, 7 }
  0x95   :  { %v166_v50 = vrot.slane %v161_v29, 1 }
  0x96   :  { %v87_v32 = vsel %vm86_vm3, %v84_v22, %v85_v27  ;;  %v88_v33 = vsel %vm86_vm3, %v85_v27, %v84_v22  ;;  %v137_v45 = vsel %vm47_vm2, %v135_v37, %v134_v34  ;;  %v136_v47 = vsel %vm47_vm2, %v134_v34, %v135_v37 }
  0x97   :  { %v89_v35 = vadd.f32 %v87_v32, %v63_v30  ;;  %v90_v36 = vadd.f32 %v88_v33, %v65_v31  ;;  %v148_v55 = vadd.f32 %v147_v28, %v137_v45 }
  0x99   :  { %v91_v38 = vsel %vm21_vm1, %v89_v35, 0.0  ;;  %v92_v39 = vsel %vm21_vm1, %v90_v36, 0.0  ;;  %v101_v40 = vmul.f32 %v89_v35, %v89_v35  ;;  %v102_v41 = vmul.f32 %v90_v36, %v90_v36 }
  0x9a   :  { %v93_v42 = vadd.f32 %v92_v39, %v91_v38 }
  0x9b   :  { %v103_v43 = vsel %vm21_vm1, %v101_v40, 0.0  ;;  %v104_v44 = vsel %vm21_vm1, %v102_v41, 0.0 }
  0x9c   :  { %v105_v46 = vadd.f32 %v104_v44, %v103_v43  ;;  %v149_v48 = vpop.f32.mrf.mxu0  ;;  %v163_v49 = vpop.f32.mrf.mxu1  ;;  %v94_v53 = vrot.slane %v93_v42, 4 }
  0x9d   :  { %v150_v51 = vadd.f32 %v149_v48, %v136_v47  ;;  %v167_v52 = vrot.slane %v163_v49, 1 }
  0x9e   :  { %v106_v54 = vrot.slane %v105_v46, 4  ;;  %v95_v60 = vadd.f32 %v94_v53, %v93_v42 }
  0x9f   :  { %v168_v56 = vsel %vm86_vm3, %v166_v50, %v167_v52  ;;  %v169_v57 = vsel %vm86_vm3, %v167_v52, %v166_v50 }
  0xa0   :  { %v170_v58 = vadd.f32 %v168_v56, %v148_v55  ;;  %v171_v59 = vadd.f32 %v169_v57, %v150_v51  ;;  %v107_v61 = vadd.f32 %v106_v54, %v105_v46  ;;  %v96_v6 = vrot.slane %v95_v60, 2 }
  0xa2   :  { %v172_v62 = vsel %vm21_vm1, %v170_v58, 0.0  ;;  %v173_v63 = vsel %vm21_vm1, %v171_v59, 0.0  ;;  %v182_v1 = vmul.f32 %v170_v58, %v170_v58  ;;  %v183_v2 = vmul.f32 %v171_v59, %v171_v59 }
  0xa3   :  { %v174_v0 = vadd.f32 %v173_v63, %v172_v62  ;;  %v108_v7 = vrot.slane %v107_v61, 2  ;;  %v97_v12 = vadd.f32 %v96_v6, %v95_v60 }
  0xa4   :  { %v184_v4 = vsel %vm21_vm1, %v182_v1, 0.0  ;;  %v185_v5 = vsel %vm21_vm1, %v183_v2, 0.0 }
  0xa5   :  { %v175_v3 = vrot.slane %v174_v0, 4  ;;  %v186_v8 = vadd.f32 %v185_v5, %v184_v4  ;;  %v109_v14 = vadd.f32 %v108_v7, %v107_v61  ;;  %v98_v18 = vrot.slane %v97_v12, 1 }
  0xa7   :  { %v176_v9 = vadd.f32 %v175_v3, %v174_v0  ;;  %v187_v10 = vrot.slane %v186_v8, 4  ;;  %v110_v19 = vrot.slane %v109_v14, 1  ;;  %v99_v23 = vadd.f32 %v98_v18, %v97_v12 }
  0xa9   :  { %v177_v11 = vrot.slane %v176_v9, 2  ;;  %v188_v13 = vadd.f32 %v187_v10, %v186_v8  ;;  %v111_v24 = vadd.f32 %v110_v19, %v109_v14 }
  0xab   :  { %v178_v15 = vadd.f32 %v177_v11, %v176_v9  ;;  %v189_v16 = vrot.slane %v188_v13, 2 }
  0xad   :  { %v179_v17 = vrot.slane %v178_v15, 1  ;;  %v190_v20 = vadd.f32 %v189_v16, %v188_v13 }
  0xaf   :  { %v180_v21 = vadd.f32 %v179_v17, %v178_v15  ;;  %v191_v22 = vrot.slane %v190_v20, 1 }
  0xb1   :  { %v192_v25 = vadd.f32 %v191_v22, %v190_v20  ;;  %v181_v26 = vadd.f32 %v180_v21, %v99_v23 }
  0xb3   :  { %v193_v27 = vadd.f32 %v192_v25, %v111_v24 }
  0xb5   :  { %v195_v28 = vsel %vm194_vm4, %v181_v26, %v193_v27 }
  0xb6   :  { %197 = vst.msk [vmem:[#allocation2] sm:$0x3] %vm196_vm5, %v195_v28 }
  0xb7   :  { %208 = dma.vmem_to_hbm [thread:$0]  %s204_s1, 32, %s206_s25, [#allocation3]  }
  0xb8   :  { %249 = dma.done.wait [#allocation3], 32  }
  0xb9   :  { %250 = vsyncadd [#allocation3], 4294967264 }
  0xba   :  { %213 = vsyncpa [#allocation3], 1 }

</bundles_post_ra>
